<compile_context>
chip_gen: v5e
topology: v5e:2x2
jax: 0.10.0
libtpu: 0.0.40
codegen_flags: <defaults>
</compile_context>

<pallas_src>
import jax
import jax.numpy as jnp
from jax.experimental import pallas as pl
from jax.experimental.pallas import tpu as pltpu


def _round_up(x, m):
    return (x + m - 1) // m * m


def _pad2d(a, rows, cols):
    pr, pc = rows - a.shape[0], cols - a.shape[1]
    if pr or pc:
        a = jnp.pad(a, ((0, pr), (0, pc)))
    return a


def _make_ffn_kernel(apply_dropout):
    """Kernel over one (row-tile, hidden-chunk) grid point."""

    def kernel(x_ref, w1_ref, b1_ref, w2_ref, b2_ref, *rest):
        if apply_dropout:
            mask_ref, o_ref, acc_ref = rest
        else:
            o_ref, acc_ref = rest
            mask_ref = None

        k = pl.program_id(1)

        @pl.when(k == 0)
        def _():
            acc_ref[...] = jnp.zeros_like(acc_ref)

        # linear1 (MXU, bf16 inputs / f32 accumulate) + bias + ReLU for this
        # hidden chunk.
        h = jnp.dot(x_ref[...], w1_ref[...],
                    preferred_element_type=jnp.float32) + b1_ref[...]
        h = jnp.maximum(h, 0.0)

        # Inverted dropout: mask already holds 0 or 1/(1-p) -> one VPU multiply.
        if mask_ref is not None:
            h = h * mask_ref[...]

        # linear2 partial product for this hidden chunk, accumulated in f32 VMEM.
        acc_ref[...] += jnp.dot(h.astype(w2_ref.dtype), w2_ref[...],
                                preferred_element_type=jnp.float32)

        @pl.when(k == pl.num_programs(1) - 1)
        def _():
            o_ref[...] = (acc_ref[...] + b2_ref[...]).astype(o_ref.dtype)

    return kernel


def feed_forward_pallas(x, w1, b1, w2, b2, *, dropout_rate=0.1, training=True,
                        dropout_key=None, tm=256, th=512,
                        compute_dtype=jnp.bfloat16):
    """FeedForwardNetwork forward.  x: [..., input_size] -> [..., output_size]."""
    if not (0.0 <= dropout_rate < 1.0):
        raise ValueError(
            "dropout_rate must be in [0, 1): p == 1 zeroes every activation and "
            "makes the inverted-dropout scale 1/(1-p) infinite.")

    d_in, hidden = w1.shape
    d_out = w2.shape[1]
    lead = x.shape[:-1]
    x2d = x.reshape(-1, d_in)
    M = x2d.shape[0]
    out_dtype = x.dtype

    # Lane-dense padding: feature dims -> multiples of 128 (full vregs, unmasked
    # stores); rows -> multiple of the row tile.  Zero padding is exact: padded
    # hidden columns are ReLU(0)=0 and padded W2 rows are 0, so they contribute
    # nothing; padded output columns/rows are sliced off below.
    d_in_p = _round_up(d_in, 128)
    d_out_p = _round_up(d_out, 128)
    hid_p = _round_up(hidden, 128)

    tm = min(tm, _round_up(M, 8))          # don't overshoot tiny inputs
    M_p = _round_up(M, tm)

    th = min(th, hid_p)                    # hidden-chunk width (multiple of 128)
    hid_p = _round_up(hid_p, th)

    x_p = _pad2d(x2d, M_p, d_in_p).astype(compute_dtype)
    w1_p = _pad2d(w1, d_in_p, hid_p).astype(compute_dtype)
    w2_p = _pad2d(w2, hid_p, d_out_p).astype(compute_dtype)
    b1_p = _pad2d(b1.reshape(1, hidden).astype(jnp.float32), 1, hid_p)
    b2_p = _pad2d(b2.reshape(1, d_out).astype(jnp.float32), 1, d_out_p)

    apply_dropout = training and dropout_rate > 0.0
    grid = (M_p // tm, hid_p // th)

    in_specs = [
        pl.BlockSpec((tm, d_in_p), lambda i, k: (i, 0)),     # x row tile
        pl.BlockSpec((d_in_p, th), lambda i, k: (0, k)),     # W1 hidden chunk
        pl.BlockSpec((1, th), lambda i, k: (0, k)),          # b1 chunk
        pl.BlockSpec((th, d_out_p), lambda i, k: (k, 0)),    # W2 hidden chunk
        pl.BlockSpec((1, d_out_p), lambda i, k: (0, 0)),     # b2
    ]
    args = [x_p, w1_p, b1_p, w2_p, b2_p]

    if apply_dropout:
        if dropout_key is None:
            dropout_key = jax.random.PRNGKey(0)
        keep = jax.random.bernoulli(dropout_key, p=1.0 - dropout_rate,
                                    shape=(M_p, hid_p))
        # Fold keep-mask and 1/(1-p) scale into a single multiplier.
        mask = keep.astype(jnp.float32) * (1.0 / (1.0 - dropout_rate))
        in_specs.append(pl.BlockSpec((tm, th), lambda i, k: (i, k)))
        args.append(mask)

    out2d = pl.pallas_call(
        _make_ffn_kernel(apply_dropout),
        out_shape=jax.ShapeDtypeStruct((M_p, d_out_p), out_dtype),
        grid_spec=pltpu.PrefetchScalarGridSpec(
            num_scalar_prefetch=0,
            grid=grid,
            in_specs=in_specs,
            out_specs=pl.BlockSpec((tm, d_out_p), lambda i, k: (i, 0)),
            scratch_shapes=[pltpu.VMEM((tm, d_out_p), jnp.float32)],
        ),
        compiler_params=pltpu.CompilerParams(
            dimension_semantics=("parallel", "arbitrary"),
            vmem_limit_bytes=64 * 1024 * 1024,
        ),
    )(*args)

    return out2d[:M, :d_out].reshape(*lead, d_out)


if __name__ == "__main__":
    # Small shapes consistent with an FFN over a [batch, seq, feature] input.
    batch, seq = 2, 8
    input_size, hidden_size, output_size = 32, 64, 32
    dropout_rate = 0.1

    key = jax.random.PRNGKey(0)
    kx, kw1, kb1, kw2, kb2, kdrop = jax.random.split(key, 6)

    x = jax.random.normal(kx, (batch, seq, input_size), dtype=jnp.float32)

    # Deterministic parameter init (PyTorch Linear-style uniform bounds).
    bound1 = 1.0 / (input_size ** 0.5)
    w1 = jax.random.uniform(kw1, (input_size, hidden_size), jnp.float32,
                            -bound1, bound1)
    b1 = jax.random.uniform(kb1, (hidden_size,), jnp.float32, -bound1, bound1)
    bound2 = 1.0 / (hidden_size ** 0.5)
    w2 = jax.random.uniform(kw2, (hidden_size, output_size), jnp.float32,
                            -bound2, bound2)
    b2 = jax.random.uniform(kb2, (output_size,), jnp.float32, -bound2, bound2)

    # Training-mode forward (dropout active, matching F.dropout's default).
    out = feed_forward_pallas(x, w1, b1, w2, b2,
                              dropout_rate=dropout_rate, training=True,
                              dropout_key=kdrop)
    jax.block_until_ready(out)
    assert out.shape == (batch, seq, output_size)
    assert out.dtype == jnp.float32
    assert bool(jnp.all(jnp.isfinite(out)))

    # Deterministic-path sanity check (dropout off) against a pure-JAX reference.
    out_eval = feed_forward_pallas(x, w1, b1, w2, b2,
                                   dropout_rate=dropout_rate, training=False)
    ref = jnp.maximum(x @ w1 + b1, 0.0) @ w2 + b2
    jax.block_until_ready(out_eval)
    max_err = float(jnp.max(jnp.abs(out_eval - ref)))
    assert max_err < 5e-2, f"mismatch vs reference, max abs err = {max_err}"

    print("KERNEL_OK")
</pallas_src>

<mosaic_0001>
module attributes {stable_mosaic.version = 11 : i64} {
  func.func @kernel(%arg0: i32, %arg1: i32, %arg2: memref<16x128xbf16, #tpu.memory_space<vmem>>, %arg3: memref<128x128xbf16, #tpu.memory_space<vmem>>, %arg4: memref<1x128xf32, #tpu.memory_space<vmem>>, %arg5: memref<128x128xbf16, #tpu.memory_space<vmem>>, %arg6: memref<1x128xf32, #tpu.memory_space<vmem>>, %arg7: memref<16x128xf32, #tpu.memory_space<vmem>>, %arg8: memref<16x128xf32, #tpu.memory_space<vmem>>, %arg9: memref<16x128xf32, #tpu.memory_space<vmem>>) attributes {dimension_semantics = [#tpu.dimension_semantics<parallel>, #tpu.dimension_semantics<arbitrary>], iteration_bounds = array<i64: 1, 1>, scalar_prefetch = 0 : i64, scratch_operands = 1 : i64, tpu.core_type = #tpu.core_type<tc>, window_params = [{transform_indices = @transform_0, window_bounds = array<i64: 16, 128>}, {transform_indices = @transform_1, window_bounds = array<i64: 128, 128>}, {transform_indices = @transform_2, window_bounds = array<i64: 1, 128>}, {transform_indices = @transform_3, window_bounds = array<i64: 128, 128>}, {pipeline_mode = #tpu.pipeline_mode<synchronous>, transform_indices = @transform_4, window_bounds = array<i64: 1, 128>}, {transform_indices = @transform_5, window_bounds = array<i64: 16, 128>}, {transform_indices = @transform_6, window_bounds = array<i64: 16, 128>}]} {
    %c0_i32 = arith.constant 0 : i32
    %0 = arith.cmpi eq, %arg1, %c0_i32 : i32
    %1 = arith.extui %0 : i1 to i32
    %c0_i32_0 = arith.constant 0 : i32
    %2 = arith.cmpi ne, %1, %c0_i32_0 : i32
    scf.if %2 {
      %cst_18 = arith.constant 0.000000e+00 : f32
      %22 = vector.broadcast %cst_18 : f32 to vector<16x128xf32>
      %c0_19 = arith.constant 0 : index
      %c0_20 = arith.constant 0 : index
      %23 = vector.load %arg9[%c0_19, %c0_20] : memref<16x128xf32, #tpu.memory_space<vmem>>, vector<16x128xf32>
      tpu.vector_store %arg9[%c0_19, %c0_20], %22 {strides = array<i32>} : memref<16x128xf32, #tpu.memory_space<vmem>>, vector<16x128xf32>,
    } else {
    }
    %c0 = arith.constant 0 : index
    %c0_1 = arith.constant 0 : index
    %3 = vector.load %arg2[%c0, %c0_1] : memref<16x128xbf16, #tpu.memory_space<vmem>>, vector<16x128xbf16>
    %c0_2 = arith.constant 0 : index
    %c0_3 = arith.constant 0 : index
    %4 = vector.load %arg3[%c0_2, %c0_3] : memref<128x128xbf16, #tpu.memory_space<vmem>>, vector<128x128xbf16>
    %cst = arith.constant dense<0.000000e+00> : vector<16x128xf32>
    %5 = tpu.matmul %3, %4, %cst {dimension_numbers = #tpu.dot_dimension_numbers<[1], [0], [0], [1], [0, 0, 1, 1], [], []>} : vector<16x128xbf16>, vector<128x128xbf16>, vector<16x128xf32> -> vector<16x128xf32>
    %c0_4 = arith.constant 0 : index
    %c0_5 = arith.constant 0 : index
    %6 = vector.load %arg4[%c0_4, %c0_5] : memref<1x128xf32, #tpu.memory_space<vmem>>, vector<1x128xf32>
    %7 = vector.broadcast %6 : vector<1x128xf32> to vector<16x128xf32>
    %8 = arith.addf %5, %7 : vector<16x128xf32>
    %cst_6 = arith.constant 0.000000e+00 : f32
    %9 = vector.broadcast %cst_6 : f32 to vector<16x128xf32>
    %10 = arith.maximumf %8, %9 : vector<16x128xf32>
    %c0_7 = arith.constant 0 : index
    %c0_8 = arith.constant 0 : index
    %11 = vector.load %arg7[%c0_7, %c0_8] : memref<16x128xf32, #tpu.memory_space<vmem>>, vector<16x128xf32>
    %12 = arith.mulf %10, %11 : vector<16x128xf32>
    %c0_9 = arith.constant 0 : index
    %c0_10 = arith.constant 0 : index
    %13 = vector.load %arg9[%c0_9, %c0_10] : memref<16x128xf32, #tpu.memory_space<vmem>>, vector<16x128xf32>
    %14 = arith.truncf %12 : vector<16x128xf32> to vector<16x128xbf16>
    %c0_11 = arith.constant 0 : index
    %c0_12 = arith.constant 0 : index
    %15 = vector.load %arg5[%c0_11, %c0_12] : memref<128x128xbf16, #tpu.memory_space<vmem>>, vector<128x128xbf16>
    %cst_13 = arith.constant dense<0.000000e+00> : vector<16x128xf32>
    %16 = tpu.matmul %14, %15, %cst_13 {dimension_numbers = #tpu.dot_dimension_numbers<[1], [0], [0], [1], [0, 0, 1, 1], [], []>} : vector<16x128xbf16>, vector<128x128xbf16>, vector<16x128xf32> -> vector<16x128xf32>
    %17 = arith.addf %13, %16 : vector<16x128xf32>
    %c0_14 = arith.constant 0 : index
    %c0_15 = arith.constant 0 : index
    %18 = vector.load %arg9[%c0_14, %c0_15] : memref<16x128xf32, #tpu.memory_space<vmem>>, vector<16x128xf32>
    tpu.vector_store %arg9[%c0_14, %c0_15], %17 {strides = array<i32>} : memref<16x128xf32, #tpu.memory_space<vmem>>, vector<16x128xf32>,
    %c0_i32_16 = arith.constant 0 : i32
    %19 = arith.cmpi eq, %arg1, %c0_i32_16 : i32
    %20 = arith.extui %19 : i1 to i32
    %c0_i32_17 = arith.constant 0 : i32
    %21 = arith.cmpi ne, %20, %c0_i32_17 : i32
    scf.if %21 {
      %c0_18 = arith.constant 0 : index
      %c0_19 = arith.constant 0 : index
      %22 = vector.load %arg9[%c0_18, %c0_19] : memref<16x128xf32, #tpu.memory_space<vmem>>, vector<16x128xf32>
      %c0_20 = arith.constant 0 : index
      %c0_21 = arith.constant 0 : index
      %23 = vector.load %arg6[%c0_20, %c0_21] : memref<1x128xf32, #tpu.memory_space<vmem>>, vector<1x128xf32>
      %24 = vector.broadcast %23 : vector<1x128xf32> to vector<16x128xf32>
      %25 = arith.addf %22, %24 : vector<16x128xf32>
      %c0_22 = arith.constant 0 : index
      %c0_23 = arith.constant 0 : index
      %26 = vector.load %arg8[%c0_22, %c0_23] : memref<16x128xf32, #tpu.memory_space<vmem>>, vector<16x128xf32>
      tpu.vector_store %arg8[%c0_22, %c0_23], %25 {strides = array<i32>} : memref<16x128xf32, #tpu.memory_space<vmem>>, vector<16x128xf32>,
    } else {
    }
    return
  }
  func.func @transform_0(%arg0: i32, %arg1: i32) -> (i32, i32) {
    %c0_i32 = arith.constant 0 : i32
    %c0_i32_0 = arith.constant 0 : i32
    return %arg0, %c0_i32 : i32, i32
  }
  func.func @transform_1(%arg0: i32, %arg1: i32) -> (i32, i32) {
    %c0_i32 = arith.constant 0 : i32
    %c0_i32_0 = arith.constant 0 : i32
    return %c0_i32, %arg1 : i32, i32
  }
  func.func @transform_2(%arg0: i32, %arg1: i32) -> (i32, i32) {
    %c0_i32 = arith.constant 0 : i32
    %c0_i32_0 = arith.constant 0 : i32
    return %c0_i32, %arg1 : i32, i32
  }
  func.func @transform_3(%arg0: i32, %arg1: i32) -> (i32, i32) {
    %c0_i32 = arith.constant 0 : i32
    %c0_i32_0 = arith.constant 0 : i32
    return %arg1, %c0_i32 : i32, i32
  }
  func.func @transform_4(%arg0: i32, %arg1: i32) -> (i32, i32) {
    %c0_i32 = arith.constant 0 : i32
    %c0_i32_0 = arith.constant 0 : i32
    %c0_i32_1 = arith.constant 0 : i32
    return %c0_i32, %c0_i32_0 : i32, i32
  }
  func.func @transform_5(%arg0: i32, %arg1: i32) -> (i32, i32) {
    %c0_i32 = arith.constant 0 : i32
    return %arg0, %arg1 : i32, i32
  }
  func.func @transform_6(%arg0: i32, %arg1: i32) -> (i32, i32) {
    %c0_i32 = arith.constant 0 : i32
    %c0_i32_0 = arith.constant 0 : i32
    return %arg0, %c0_i32 : i32, i32
  }
}

</mosaic_0001>

<bundles_post_ra>
// kernel: tpu_custom_call.1
= control target key start
LH: loop header
LB: loop body
LE: loop exit
PB: predicated region body
PF: predicated region fallthrough
CT: control target
= control target key end

     0   :  { %11 = vsyncpa [#allocation4], 0  ;;  %s603_s0 = inlined_call_operand.hbm [shape: bf16[16,128], index: 0, kind: input, shape index: {}]   ;;  %s604_s1 = inlined_call_operand.hbm [shape: bf16[128,128], index: 1, kind: input, shape index: {}]   ;;  %s605_s2 = inlined_call_operand.vmem [shape: f32[1,128], index: 2, kind: input, shape index: {}]   ;;  %s606_s3 = inlined_call_operand.hbm [shape: bf16[128,128], index: 3, kind: input, shape index: {}]   ;;  %s607_s4 = inlined_call_operand.vmem [shape: f32[1,128], index: 4, kind: input, shape index: {}]   ;;  %s608_s5 = inlined_call_operand.hbm [shape: f32[16,128], index: 5, kind: input, shape index: {}]   ;;  %s609_s6 = inlined_call_operand.hbm [shape: f32[16,128], index: 6, kind: output, shape index: {}]  }
   0x1   :  { %12 = vsyncpa [#allocation7], 0 }
   0x2   :  { %13 = vsyncpa [#allocation10], 0 }
   0x3   :  { %14 = vsyncpa [#allocation5], 0  ;;  %s32_s23 = sshll.u32 %s604_s1, 4  ;;  %s532_s24 = smov [#allocation6]   ;;  %s33_s23 = int_to_ptr.hbm [resolvable:$true] %s32_s23 }
   0x4   :  { %s34_s25 = sshll.u32 %s532_s24, 4  ;;  %s19_s28 = sshll.u32 %s603_s0, 4  ;;  %s35_s25 = int_to_ptr.vmem [resolvable:$true] %s34_s25  ;;  %s20_s28 = int_to_ptr.hbm [resolvable:$true] %s19_s28 }
   0x5   :  { %s533_s29 = smov 64   ;;  %s534_s30 = smov 4  }
   0x6   :  { %40 = dma.hbm_to_vmem [thread:$0]  %s33_s23, 1024, %s35_s25, [#allocation7], %s533_s29, %s533_s29, %s534_s30  }
   0x7   :  { %s535_s7 = smov [#allocation3]   ;;  %s47_s11 = sshll.u32 %s606_s3, 4  ;;  %s48_s11 = int_to_ptr.hbm [resolvable:$true] %s47_s11 }
   0x8   :  { %s21_s8 = sshll.u32 %s535_s7, 4  ;;  %s62_s13 = sshll.u32 %s608_s5, 4  ;;  %s22_s8 = int_to_ptr.vmem [resolvable:$true] %s21_s8  ;;  %s63_s13 = int_to_ptr.hbm [resolvable:$true] %s62_s13 }
   0x9   :  { %27 = dma.hbm_to_vmem [thread:$0]  %s20_s28, 128, %s22_s8, [#allocation4], %s533_s29, %s533_s29, %s534_s30  }
   0xa   :  { %s536_s14 = smov [#allocation8]   ;;  %s537_s0 = smov [#allocation9]  }
   0xb   :  { %s49_s15 = sshll.u32 %s536_s14, 4  ;;  %s64_s16 = sshll.u32 %s537_s0, 4  ;;  %s50_s15 = int_to_ptr.vmem [resolvable:$true] %s49_s15  ;;  %s65_s16 = int_to_ptr.vmem [resolvable:$true] %s64_s16 }
   0xc   :  { %55 = dma.hbm_to_vmem [thread:$0]  %s48_s11, 1024, %s50_s15, [#allocation7], %s533_s29, %s533_s29, %s534_s30  }
   0xd   :  { %s538_s17 = smov 128   ;;  %s539_s18 = smov 8  }
   0xe   :  { %70 = dma.hbm_to_vmem [thread:$0]  %s63_s13, 256, %s65_s16, [#allocation10], %s538_s17, %s538_s17, %s539_s18  }
   0xf   :  { %524 = dma.done.wait [#allocation4], 128  }
  0x10   :  { %525 = vsyncadd [#allocation4], 4294967168 }
  0x11   :  { %526 = dma.done.wait [#allocation7], 2048  }
  0x12   :  { %527 = vsyncadd [#allocation7], 4294965248 }
  0x13   :  { %528 = dma.done.wait [#allocation10], 256  }
  0x14   :  { %529 = vsyncadd [#allocation10], 4294967040  ;;  %v384_v0 = vld [vmem:[#allocation6 + $0x38] sm:$0xff]  ;;  %v383_v1 = vld [vmem:[#allocation6 + $0x30] sm:$0xff]  ;;  %s540_s21 = smov [#allocation11]   ;;  %s293_s24 = sshll.u32 %s609_s6, 4  ;;  %s294_s24 = int_to_ptr.hbm [resolvable:$true] %s293_s24 }
  0x15   :  { %169 = vmatpush.bf16.msra.mxu0 %v384_v0  ;;  %v392_v2 = vld [vmem:[#allocation8 + $0x38] sm:$0xff]  ;;  %v391_v3 = vld [vmem:[#allocation8 + $0x30] sm:$0xff]  ;;  %v382_v4 = vld [vmem:[#allocation6 + $0x28] sm:$0xff] }
  0x16   :  { %256 = vmatpush.bf16.msra.mxu1 %v392_v2  ;;  %v390_v5 = vld [vmem:[#allocation8 + $0x28] sm:$0xff]  ;;  %v381_v6 = vld [vmem:[#allocation6 + $0x20] sm:$0xff]  ;;  %v380_v8 = vld [vmem:[#allocation6 + $0x18] sm:$0xff] }
  0x17   :  { %v389_v7 = vld [vmem:[#allocation8 + $0x20] sm:$0xff]  ;;  %v379_v9 = vld [vmem:[#allocation6 + $0x10] sm:$0xff]  ;;  %v378_v10 = vld [vmem:[#allocation6 + $0x8] sm:$0xff] }
  0x18   :  { %v377_v11 = vld [vmem:[#allocation6] sm:$0xff]  ;;  %v376_v12 = vld [vmem:[#allocation3] sm:$0xff]  ;;  %v387_v14 = vld [vmem:[#allocation8 + $0x10] sm:$0xff] }
  0x19   :  { %170 = vmatpush.bf16.msra.mxu0 %v383_v1  ;;  %v388_v13 = vld [vmem:[#allocation8 + $0x18] sm:$0xff]  ;;  %v386_v15 = vld [vmem:[#allocation8 + $0x8] sm:$0xff]  ;;  %v385_v16 = vld [vmem:[#allocation8] sm:$0xff] }
  0x1a   :  { %257 = vmatpush.bf16.msra.mxu1 %v391_v3  ;;  %v402_v18 = vld [vmem:[%s605_s2] ss:$0 sm:$0xff]  ;;  %v185_v23 = vld [vmem:[#allocation9] sm:$0xff]  ;;  %v186_v24 = vld [vmem:[#allocation9 + $0x8] sm:$0xff]  ;;  %s291_s2 = sshll.u32 %s540_s21, 4  ;;  %s292_s2 = int_to_ptr.vmem [resolvable:$true] %s291_s2 }
  0x1b   :  { %v403_v29 = vld [vmem:[%s607_s4] ss:$0 sm:$0xff] }
  0x1d   :  { %171 = vmatpush.bf16.msra.mxu0 %v382_v4 }
  0x1e   :  { %258 = vmatpush.bf16.msra.mxu1 %v390_v5 }
  0x21   :  { %172 = vmatpush.bf16.msra.mxu0 %v381_v6 }
  0x22   :  { %259 = vmatpush.bf16.msra.mxu1 %v389_v7 }
  0x25   :  { %173 = vmatpush.bf16.msra.mxu0 %v380_v8 }
  0x26   :  { %260 = vmatpush.bf16.msra.mxu1 %v388_v13 }
  0x29   :  { %174 = vmatpush.bf16.msra.mxu0 %v379_v9 }
  0x2a   :  { %261 = vmatpush.bf16.msra.mxu1 %v387_v14 }
  0x2d   :  { %175 = vmatpush.bf16.msra.mxu0 %v378_v10 }
  0x2e   :  { %262 = vmatpush.bf16.msra.mxu1 %v386_v15 }
  0x31   :  { %176 = vmatpush.bf16.msra.mxu0 %v377_v11 }
  0x32   :  { %263 = vmatpush.bf16.msra.mxu1 %v385_v16 }
  0x34   :  { %177 = vmatmul.bf16.vlgmr.msra.gmra.mxu0 %v376_v12 }
  0xb1   :  { %v178_v17 = vpop.f32.mrf.mxu0 }
  0xb2   :  { %v179_v19 = vadd.f32 %v402_v18, %v178_v17 }
  0xb4   :  { %v183_v21 = vmax.f32 %v179_v19, 0.0 }
  0xb6   :  { %v187_v26 = vmul.f32 %v185_v23, %v183_v21 }
  0xb9   :  { %v180_v20 = vpop.f32.mrf.mxu0 }
  0xba   :  { %v181_v22 = vadd.f32 %v402_v18, %v180_v20 }
  0xbc   :  { %v184_v25 = vmax.f32 %v181_v22, 0.0 }
  0xbe   :  { %v188_v27 = vmul.f32 %v186_v24, %v184_v25 }
  0xc0   :  { %v191_v28 = vpack.c.bf16 %v188_v27, %v187_v26 }
  0xc2   :  { %264 = vmatmul.bf16.vlgmr.msra.gmra.mxu1 %v191_v28 }
 0x13f   :  { %v265_v30 = vpop.f32.mrf.mxu1 }
 0x140   :  { %v283_v31 = vadd.f32 %v403_v29, %v265_v30 }
 0x142   :  { %285 = vst [vmem:[#allocation11] sm:$0xff] %v283_v31 }
 0x147   :  { %v267_v32 = vpop.f32.mrf.mxu1 }
 0x148   :  { %v284_v33 = vadd.f32 %v403_v29, %v267_v32 }
 0x14a   :  { %286 = vst [vmem:[#allocation11 + $0x8] sm:$0xff] %v284_v33 }
 0x14b   :  { %299 = dma.vmem_to_hbm [thread:$0]  %s292_s2, 256, %s294_s24, [#allocation5], %s538_s17, %s538_s17, %s539_s18  }
 0x14c   :  { %530 = dma.done.wait [#allocation5], 256  }
 0x14d   :  { %531 = vsyncadd [#allocation5], 4294967040 }
 0x14e   :  { %304 = vsyncpa [#allocation4], 1 }
 0x14f   :  { %305 = vsyncpa [#allocation7], 1 }
 0x150   :  { %306 = vsyncpa [#allocation10], 1 }
 0x151   :  { %307 = vsyncpa [#allocation5], 1 }

</bundles_post_ra>
